<compile_context>
chip_gen: v7x
topology: tpu7x:2x2x1
jax: 0.10.0
libtpu: 0.0.40
codegen_flags: <defaults>
</compile_context>

<pallas_src>
import jax
import jax.numpy as jnp
from jax.experimental import pallas as pl
from jax.experimental.pallas import tpu as pltpu


def _round_up(x, m):
    return ((x + m - 1) // m) * m


def _proto_dist_kernel(proto_ref, feat_ref, out_ref):
    # proto_ref: (K, C)      resident prototypes
    # feat_ref : (1, C, T)   spatial tile of one image's features
    # out_ref  : (1, K, T)   lane-dense distances
    p = proto_ref[...]                                  # (K, C) f32
    f = feat_ref[0]                                     # (C, T) f32
    # cross term on the MXU; HW stays on the output lanes (unmasked stores)
    dot = jnp.dot(p, f, preferred_element_type=jnp.float32,
                  precision=jax.lax.Precision.HIGHEST)  # (K, T)
    p_sq = jnp.sum(p * p, axis=1, keepdims=True)        # (K, 1)
    f_sq = jnp.sum(f * f, axis=0, keepdims=True)        # (1, T)
    # clamp keeps ragged boundary columns / tiny cancellations finite (no NaN)
    d2 = jnp.maximum(p_sq + f_sq - 2.0 * dot, 0.0)
    out_ref[0] = jnp.sqrt(d2).astype(out_ref.dtype)


def feat_prototype_distance(feat, objective_vectors, class_numbers):
    """feat: (N, C, H, W) float32; objective_vectors: (1, class_numbers, C)."""
    N, C, H, W = feat.shape
    K = class_numbers
    HW = H * W

    # --- VMEM budgeting derived from the chip (64 MiB/TC on v7x, 128 MiB else)
    try:
        vmem_cap = pltpu.get_tpu_info().vmem_capacity_bytes
    except Exception:
        vmem_cap = 128 * 1024 * 1024
    if vmem_cap <= 64 * 1024 * 1024:            # v7x
        slab_budget = 22 * 1024 * 1024
        vmem_limit = 48 * 1024 * 1024
    else:                                       # v5e / v6e
        slab_budget = 44 * 1024 * 1024
        vmem_limit = 64 * 1024 * 1024

    # --- spatial tile: biggest 128-lane multiple whose double-buffered
    #     feat (C x T) + out (K x T) f32 slabs fit the budget
    lane_bytes = 4 * (C + K) * 2                # x2 for double buffering
    max_lanes = max(128, (slab_budget // lane_bytes) // 128 * 128)
    tile_hw = min(_round_up(HW, 128), max_lanes, 32768)
    num_hw_tiles = pl.cdiv(HW, tile_hw)
    # ensure >= 2 parallel grid steps so both v7x TensorCores get work
    if N * num_hw_tiles < 2 and tile_hw > 128:
        tile_hw = _round_up(max(tile_hw // 2, 128), 128)
        num_hw_tiles = pl.cdiv(HW, tile_hw)

    feat_flat = feat.reshape(N, C, HW).astype(jnp.float32)   # metadata-only
    proto = objective_vectors[0].astype(jnp.float32)         # (K, C), tiny

    cost = pl.CostEstimate(
        flops=2 * N * K * C * HW + 3 * N * C * HW + 4 * N * K * HW,
        transcendentals=N * K * HW,
        bytes_accessed=4 * (N * C * HW + K * C + N * K * HW),
    )

    out = pl.pallas_call(
        _proto_dist_kernel,
        out_shape=jax.ShapeDtypeStruct((N, K, HW), jnp.float32),
        grid_spec=pltpu.PrefetchScalarGridSpec(
            num_scalar_prefetch=0,
            grid=(N, num_hw_tiles),
            in_specs=[
                # prototypes: resident full (K, C) block every step
                pl.BlockSpec((K, C), lambda n, t: (0, 0)),
                # one spatial tile of one image's features per step
                # (C equals the full array dim, so no (8,128) padding needed)
                pl.BlockSpec((1, C, tile_hw), lambda n, t: (n, 0, t)),
            ],
            # K equals the full output dim; ragged last HW tile is masked
            out_specs=pl.BlockSpec((1, K, tile_hw), lambda n, t: (n, 0, t)),
        ),
        compiler_params=pltpu.CompilerParams(
            dimension_semantics=("parallel", "parallel"),
            vmem_limit_bytes=vmem_limit,
        ),
        cost_estimate=cost,
    )(proto, feat_flat)

    return out.reshape(N, K, H, W)


def _reference(feat, objective_vectors, class_numbers):
    # pure-JAX reference of the PyTorch loop
    proto = objective_vectors[0]                                   # (K, C)
    diff = proto[None, :, :, None, None] - feat[:, None, :, :, :]  # (N,K,C,H,W)
    return jnp.sqrt(jnp.sum(diff * diff, axis=2))                  # (N, K, H, W)


if __name__ == "__main__":
    key = jax.random.PRNGKey(0)
    k1, k2 = jax.random.split(key)

    N, C, H, W = 2, 4, 16, 16
    class_numbers = 8

    feat = jax.random.normal(k1, (N, C, H, W), dtype=jnp.float32)
    objective_vectors = jax.random.normal(
        k2, (1, class_numbers, C), dtype=jnp.float32)

    out = feat_prototype_distance(feat, objective_vectors, class_numbers)
    out = jax.block_until_ready(out)

    ref = _reference(feat, objective_vectors, class_numbers)
    assert out.shape == (N, class_numbers, H, W)
    assert out.dtype == jnp.float32
    assert jnp.allclose(out, ref, rtol=1e-3, atol=1e-3), "mismatch vs reference"

    print("KERNEL_OK")
</pallas_src>

<mosaic_0001>
module attributes {stable_mosaic.version = 11 : i64} {
  func.func @_proto_dist_kernel(%arg0: i32, %arg1: i32, %arg2: memref<8x4xf32, #tpu.memory_space<vmem>>, %arg3: memref<1x4x256xf32, #tpu.memory_space<vmem>>, %arg4: memref<1x8x256xf32, #tpu.memory_space<vmem>>) attributes {dimension_semantics = [#tpu.dimension_semantics<parallel>, #tpu.dimension_semantics<parallel>], iteration_bounds = array<i64: 2, 1>, scalar_prefetch = 0 : i64, scratch_operands = 0 : i64, tpu.core_type = #tpu.core_type<tc>, window_params = [{pipeline_mode = #tpu.pipeline_mode<synchronous>, transform_indices = @transform_0, window_bounds = array<i64: 8, 4>}, {transform_indices = @transform_1, window_bounds = array<i64: 1, 4, 256>}, {transform_indices = @transform_2, window_bounds = array<i64: 1, 8, 256>}]} {
    %c0 = arith.constant 0 : index
    %c0_0 = arith.constant 0 : index
    %0 = vector.load %arg2[%c0, %c0_0] : memref<8x4xf32, #tpu.memory_space<vmem>>, vector<8x4xf32>
    %c0_1 = arith.constant 0 : index
    %c0_2 = arith.constant 0 : index
    %c0_3 = arith.constant 0 : index
    %1 = vector.load %arg3[%c0_1, %c0_2, %c0_3] : memref<1x4x256xf32, #tpu.memory_space<vmem>>, vector<1x4x256xf32>
    %2 = vector.shape_cast %1 : vector<1x4x256xf32> to vector<4x256xf32>
    %cst = arith.constant dense<0.000000e+00> : vector<8x256xf32>
    %3 = tpu.matmul %0, %2, %cst {dimension_numbers = #tpu.dot_dimension_numbers<[1], [0], [0], [1], [0, 0, 1, 1], [], []>, precision = #tpu.contract_precision<fp32>} : vector<8x4xf32>, vector<4x256xf32>, vector<8x256xf32> -> vector<8x256xf32>
    %4 = arith.mulf %0, %0 : vector<8x4xf32>
    %cst_4 = arith.constant dense<0.000000e+00> : vector<8xf32>
    %5 = vector.multi_reduction <add>, %4, %cst_4 [1] : vector<8x4xf32> to vector<8xf32>
    %6 = vector.shape_cast %5 : vector<8xf32> to vector<8x1xf32>
    %7 = arith.mulf %2, %2 : vector<4x256xf32>
    %cst_5 = arith.constant dense<0.000000e+00> : vector<256xf32>
    %8 = vector.multi_reduction <add>, %7, %cst_5 [0] : vector<4x256xf32> to vector<256xf32>
    %9 = vector.shape_cast %8 : vector<256xf32> to vector<1x256xf32>
    %10 = vector.broadcast %6 : vector<8x1xf32> to vector<8x256xf32>
    %11 = vector.broadcast %9 : vector<1x256xf32> to vector<8x256xf32>
    %12 = arith.addf %10, %11 : vector<8x256xf32>
    %cst_6 = arith.constant 2.000000e+00 : f32
    %13 = vector.broadcast %cst_6 : f32 to vector<8x256xf32>
    %14 = arith.mulf %13, %3 : vector<8x256xf32>
    %15 = arith.subf %12, %14 : vector<8x256xf32>
    %cst_7 = arith.constant 0.000000e+00 : f32
    %16 = vector.broadcast %cst_7 : f32 to vector<8x256xf32>
    %17 = arith.maximumf %15, %16 : vector<8x256xf32>
    %18 = math.sqrt %17 : vector<8x256xf32>
    %c0_8 = arith.constant 0 : index
    %c0_9 = arith.constant 0 : index
    %c0_10 = arith.constant 0 : index
    %19 = vector.load %arg4[%c0_8, %c0_9, %c0_10] : memref<1x8x256xf32, #tpu.memory_space<vmem>>, vector<1x8x256xf32>
    %20 = vector.shape_cast %19 : vector<1x8x256xf32> to vector<8x256xf32>
    %21 = vector.shape_cast %18 : vector<8x256xf32> to vector<1x8x256xf32>
    tpu.vector_store %arg4[%c0_8, %c0_9, %c0_10], %21 {strides = array<i32>} : memref<1x8x256xf32, #tpu.memory_space<vmem>>, vector<1x8x256xf32>,
    return
  }
  func.func @transform_0(%arg0: i32, %arg1: i32) -> (i32, i32) {
    %c0_i32 = arith.constant 0 : i32
    %c0_i32_0 = arith.constant 0 : i32
    %c0_i32_1 = arith.constant 0 : i32
    return %c0_i32, %c0_i32_0 : i32, i32
  }
  func.func @transform_1(%arg0: i32, %arg1: i32) -> (i32, i32, i32) {
    %c0_i32 = arith.constant 0 : i32
    %c0_i32_0 = arith.constant 0 : i32
    return %arg0, %c0_i32, %arg1 : i32, i32, i32
  }
  func.func @transform_2(%arg0: i32, %arg1: i32) -> (i32, i32, i32) {
    %c0_i32 = arith.constant 0 : i32
    %c0_i32_0 = arith.constant 0 : i32
    return %arg0, %c0_i32, %arg1 : i32, i32, i32
  }
}

</mosaic_0001>

<bundles_post_ra>
// kernel: tpu_custom_call.1
= control target key start
LH: loop header
LB: loop body
LE: loop exit
PB: predicated region body
PF: predicated region fallthrough
CT: control target
= control target key end

     0   :  { %7 = vsyncpa [#allocation3], 0  ;;  %s1324_s0 = inlined_call_operand.hbm [shape: f32[8,4], index: 0, kind: input, shape index: {}]   ;;  %s1325_s1 = inlined_call_operand.hbm [shape: f32[2,4,256], index: 1, kind: input, shape index: {}]   ;;  %s1326_s2 = inlined_call_operand.hbm [shape: f32[2,8,256], index: 2, kind: output, shape index: {}]  }
   0x1   :  { %8 = vsyncpa [#allocation6], 0 }
   0x2   :  { %10 = vsyncpa [#allocation6 + $0x1], 0 }
   0x3   :  { %11 = vsyncpa [#allocation4], 0 }
   0x4   :  { %13 = vsyncpa [#allocation4 + $0x1], 0  ;;  %s1103_s9 = smov 0   ;;  %s1105_s10 = smov 0  }
   0x5   :  { %s1107_s11 = smov 0   ;;  %s1109_s12 = smov 0  }
   0x6   :  { %s1111_s13 = smov 0   ;;  %s1113_s14 = smov 0  }
   0x7 LB: > { %s830_s15 = sadd.s32 4294967295, %s1082_s14   ;;  %s831_s16 = sadd.s32 4294967294, %s1082_s14   ;;  %s1082_s14 = sphi %s1113_s14, %s19_s14   ;;  %s1078_s13 = sphi %s1111_s13, %s1351_s13   ;;  %s1074_s12 = sphi %s1109_s12, %s1350_s12   ;;  %s1070_s11 = sphi %s1107_s11, %s1349_s11   ;;  %s1066_s10 = sphi %s1105_s10, %s1348_s10   ;;  %s1062_s9 = sphi %s1103_s9, %s1347_s9  }
   0x8   : > { %p74_p0 = scmp.ne.s32.totalorder %s1066_s10, %s1062_s9  ;;  %p1137_p1 = scmp.eq.s32.totalorder %s830_s15, 0 }
   0x9   : > { %p1141_p2 = scmp.eq.s32.totalorder %s830_s15, 1  ;;  %p106_p3 = scmp.eq.s32.totalorder %s831_s16, 1 }
   0xa   : > { %s1331_s17 = scalar_select %p1137_p1, 1, 0 }
   0xb   : > { %s1332_s18 = scalar_select %p1141_p2, 1, 0 }
   0xc   : > { %p1147_p4 = por %p1137_p1, %p74_p0  ;;  %p832_p5 = scmp.ge.s32.totalorder %s1082_s14, 1 }
   0xd   : > { %p1152_p6 = por %p106_p3, %p74_p0  ;;  %p113_p7 = scmp.lt.s32.totalorder %s1082_s14, 3 }
   0xe   : > { %s1333_s19 = scalar_select %p1147_p4, 1, 0 }
   0xf   : > { %s1334_s20 = scalar_select %p1152_p6, 1, 0 }
  0x10   : > { %p1157_p8 = pnand %p832_p5, %p113_p7  ;;  %s1084_s22 = smov [#allocation2]  }
  0x11   : > { %s126_s23 = sshll.u32 %s1084_s22, 4  ;;  %s31_s25 = sadd.s32 1, %s1078_s13  ;;  %s127_s23 = int_to_ptr.vmem [resolvable:$true] %s126_s23 }
  0x12   : > { %s1335_s21 = scalar_select %p1157_p8, 1, 0 }
  0x13   : > { %p867_p10 = pneg %p1157_p8  ;;  %s61_s26 = sadd.s32 1, %s1070_s11 }
  0x14   : > { %p1172_p12 = scmp.ge.s32.totalorder %s31_s25, 2  ;;  %s938_s30 = scalar_lea.hbm %s1324_s0, 128 }
  0x15   : > { %p1166_p11 = pnand %p867_p10, %p1137_p1  ;;  %p939_p13 = scmp.ne.s32.totalorder %s1324_s0, %s938_s30 }
  0x16   : > { %s1337_s27 = scalar_select %p1172_p12, 1, 0 }
  0x17   : > { %p940_p0 = pneg %p1166_p11  ;;  %p945_p7 = scmp.lt.u32.totalorder %s938_s30, %s1324_s0 }
  0x19   : > { %p941_p3 = pnand %p940_p0, %p939_p13 }
  0x1b   : > { %p942_p5 = pneg %p941_p3 }
  0x1d   : > { %p947_p10 = pnand %p945_p7, %p942_p5 }
  0x1f   : > { %950 = shalt.err (!%p947_p10)
}
  0x20   : > { %s951_s7 = scalar_lea.vmem %s127_s23, 128  ;;  %p959_p1 = scmp.lt.s32.totalorder %s127_s23, %s127_s23 }
  0x21   : > { %p952_p9 = scmp.ne.s32.totalorder %s127_s23, %s951_s7  ;;  %p960_p8 = scmp.lt.s32.totalorder %s951_s7, %s951_s7 }
  0x23   : > { %p954_p6 = pnand %p952_p9, %p940_p0  ;;  %p961_p2 = por %p960_p8, %p959_p1 }
  0x25   : > { %p955_p4 = pneg %p954_p6 }
  0x27   : > { %p962_p12 = pnand %p961_p2, %p955_p4 }
  0x29   : > { %965 = shalt.err (!%p962_p12)
}
  0x2a   : > { %870 = dma.hbm_to_vmem [thread:$0]  (!%p1166_p11), %s1324_s0, 128, %s127_s23, [#allocation3]  }
  0x2b   : > { %p1338_p1 = scmp.ne.s32.totalorder %s1337_s27, 0  ;;  %p68_p2 = scmp.ne.s32.totalorder %s1070_s11, %s1066_s10 }
  0x2c   : > { %p69_p4 = scmp.eq.s32.totalorder %s1082_s14, 0  ;;  %p880_p6 = scmp.lt.s32.totalorder %s1082_s14, 2 }
  0x2d   : > { %s1353_s25 = smov (%p1338_p1, %s31_s25), 0  ;;  %p1339_p12 = scmp.ne.s32.totalorder %s1332_s18, 0 }
  0x2e   : > { %s56_s16 = ssub.s32 %s1078_s13, %s1353_s25  ;;  %p70_p9 = por %p69_p4, %p68_p2 }
  0x2f   : > { %p59_p8 = scmp.eq.s32.totalorder %s56_s16, 0  ;;  %p1204_p13 = por %p1339_p12, %p68_p2 }
  0x30   : > { %s137_s24 = sand.u32 1, %s1070_s11   ;;  %s847_s27 = sshll.u32 %s1078_s13, 7 }
  0x31   : > { %s1212_s28 = scalar_select %p59_p8, %s1070_s11, %s61_s26  }
  0x32   : > { %s835_s23 = sshll.u32 %s137_s24, 3  ;;  %s1218_s3 = scalar_lea.hbm %s1325_s1, %s847_s27 }
  0x33   : > { %s141_s18 = scalar_lea.vmem [#allocation5], %s835_s23  ;;  %p1222_p11 = pnand %p880_p6, %p70_p9 }
  0x34   : > { %s151_s4 = sshll.u32 %s141_s18, 4  ;;  %s138_s26 = scalar_lea.sflag [#allocation6], %s137_s24  ;;  %s1220_s4 = int_to_ptr.vmem [resolvable:$true] %s151_s4 }
  0x35   : > { %s966_s6 = scalar_lea.hbm %s1218_s3, 128  ;;  %p968_p3 = pneg %p1222_p11 }
  0x36   : > { %p967_p0 = scmp.ne.s32.totalorder %s1218_s3, %s966_s6  ;;  %s971_s15 = scalar_lea.hbm %s1325_s1, 256 }
  0x37   : > { %p972_p10 = scmp.lt.u32.totalorder %s1218_s3, %s1325_s1  ;;  %p973_p1 = scmp.lt.u32.totalorder %s971_s15, %s966_s6 }
  0x38   : > { %p969_p5 = pnand %p968_p3, %p967_p0  ;;  %p975_p4 = scmp.lt.u32.totalorder %s966_s6, %s1218_s3 }
  0x39   : > { %p974_p2 = por %p973_p1, %p972_p10 }
  0x3a   : > { %p970_p7 = pneg %p969_p5 }
  0x3b   : > { %p976_p6 = por %p975_p4, %p974_p2 }
  0x3d   : > { %p977_p8 = pnand %p976_p6, %p970_p7 }
  0x3f   : > { %980 = shalt.err (!%p977_p8)
}
  0x40   : > { %s981_s24 = scalar_lea.vmem %s1220_s4, 128  ;;  %s1085_s27 = smov [#allocation5]  }
  0x41   : > { %p982_p9 = scmp.ne.s32.totalorder %s1220_s4, %s981_s24  ;;  %s986_s29 = sshll.u32 %s1085_s27, 4  ;;  %s987_s29 = int_to_ptr.vmem [resolvable:$false] %s986_s29 }
  0x42   : > { %s988_s30 = scalar_lea.vmem %s987_s29, 256  ;;  %p989_p5 = scmp.lt.s32.totalorder %s1220_s4, %s987_s29 }
  0x43   : > { %p984_p12 = pnand %p982_p9, %p968_p3  ;;  %p990_p10 = scmp.lt.s32.totalorder %s988_s30, %s981_s24 }
  0x45   : > { %p985_p0 = pneg %p984_p12  ;;  %p991_p1 = por %p990_p10, %p989_p5 }
  0x47   : > { %p992_p2 = pnand %p991_p1, %p985_p0 }
  0x49   : > { %995 = shalt.err (!%p992_p2)
}
  0x4a   : > { %874 = dma.hbm_to_vmem [thread:$0]  (!%p1222_p11), %s1218_s3, 128, %s1220_s4, %s138_s26  }
  0x4b   : > { %p1342_p7 = scmp.ne.s32.totalorder %s1335_s21, 0 }
  0x4c   : > { %p1343_p3 = scmp.ne.s32.totalorder (!%p1342_p7), %s1331_s17, 0 }
  0x4d   : > { %160 = sbr.rel (%p1342_p7) target bundleno = 367 (0x16f), region = 28 }
  0x54   : > { %1049 = dma.done.wait (%p1343_p3), [#allocation3], 128  }
  0x55   : > { %1051 = vsyncadd (%p1343_p3), [#allocation3], 4294967168  ;;  %s1258_s18 = sand.u32 1, %s1066_s10   ;;  %p1344_p4 = scmp.ne.s32.totalorder %s1333_s19, 0 }
  0x56   : > { %s840_s6 = sshll.u32 %s1258_s18, 3  ;;  %s167_s5 = scalar_lea.sflag [#allocation6], %s1258_s18 }
  0x57   : > { %s170_s7 = scalar_lea.vmem [#allocation5], %s840_s6 }
  0x58   : > { %1053 = dma.done.wait (%p1344_p4), %s167_s5, 128  }
  0x59   : > { %1055 = vsyncadd (%p1344_p4), %s167_s5, 4294967168  ;;  %v1086_v0 = vmov 0.0   ;;  %vm201_vm0 = vcmask 1043456   ;;  %vm197_vm1 = vcmask 31744   ;;  %v194_v1 = vld [vmem:[%s170_s7] sm:$0xff]  ;;  %v193_v2 = vld [vmem:[#allocation2] sm:$0xff] }
  0x5a   : > { %509 = vmatprep.mubr.f32.mxu0 %v1086_v0  ;;  %272 = vmatprep.mubr.f32.mxu1 %v1086_v0  ;;  %v196_v3 = vcombine.high %v194_v1, %v194_v1  ;;  %v202_v4 = vsel %vm201_vm0, %v194_v1, 0  ;;  %v199_v5 = vsel %vm197_vm1, %v193_v2, 0  ;;  %v671_v6 = vmul.f32 %v193_v2, %v193_v2  ;;  %s841_s17 = sshll.u32 %s1258_s18, 4  ;;  %s848_s19 = sshll.u32 %s1074_s12, 8 }
  0x5b   : > { %v208_v7 = vand.u32 4294901760, %v202_v4  ;;  %v273_v8 = vand.u32 4294901760, %v199_v5  ;;  %v675_v24 = vmul.f32 %v194_v1, %v194_v1  ;;  %s190_s21 = scalar_lea.vmem [#allocation7], %s841_s17  ;;  %s1275_s8 = scalar_lea.hbm %s1326_s2, %s848_s19 }
  0x5c   : > { %v204_v9 = vsel %vm201_vm0, %v196_v3, 0  ;;  %v672_v10 = vsel %vm197_vm1, %v671_v6, 0.0  ;;  %s734_s3 = sshll.u32 %s190_s21, 4  ;;  %s718_s12 = scalar_lea.sflag [#allocation4], %s1258_s18  ;;  %s1277_s3 = int_to_ptr.vmem [resolvable:$true] %s734_s3 }
  0x5d   : > { %v206_v11 = vand.u32 4294901760, %v204_v9  ;;  %v291_v12 = vsub.f32 %v202_v4, %v208_v7  ;;  %v274_v13 = vsub.f32 %v199_v5, %v273_v8  ;;  %673 = vadd.xlane.f32.xlu0 %v672_v10  ;;  %v677_v25 = vcombine.high %v675_v24, %v675_v24  ;;  %s996_s15 = scalar_lea.vmem %s1277_s3, 256  ;;  %s1087_s16 = smov [#allocation7]  }
  0x5e   : > { %v679_v26 = vsel %vm201_vm0, %v675_v24, 0.0  ;;  %p997_p11 = scmp.ne.s32.totalorder %s1277_s3, %s996_s15  ;;  %s1000_s23 = sshll.u32 %s1087_s16, 4  ;;  %s1001_s23 = int_to_ptr.vmem [resolvable:$false] %s1000_s23 }
  0x5f   : > { %444 = vmatprep.subr.mxu0 %v206_v11  ;;  %v275_v14 = vand.u32 4294901760, %v274_v13  ;;  %207 = vmatprep.subr.mxu1 %v206_v11  ;;  %v285_v15 = vsub.f32 %v204_v9, %v206_v11  ;;  %v292_v16 = vand.u32 4294901760, %v291_v12  ;;  %v686_v27 = vsel %vm201_vm0, %v677_v25, 0.0  ;;  %s1002_s24 = scalar_lea.vmem %s1001_s23, 512  ;;  %p1003_p9 = scmp.lt.s32.totalorder %s1277_s3, %s1001_s23 }
  0x60   : > { %446 = vmatpush1.msra.mxu0 %v208_v7  ;;  %209 = vmatpush1.msra.mxu1 %v208_v7  ;;  %v680_v28 = vrot.slane %v679_v26, 4  ;;  %v687_v29 = vrot.slane %v686_v27, 4  ;;  %p998_p6 = pnand %p997_p11, %p1204_p13  ;;  %p1004_p12 = scmp.lt.s32.totalorder %s1002_s24, %s996_s15 }
  0x61   : > { %513 = vmatmul.mubr.f32.vlgmr.msra.gmra.mrb[0].mxu0 %v275_v14  ;;  %v276_v17 = vsub.f32 %v274_v13, %v275_v14  ;;  %v286_v18 = vand.u32 4294901760, %v285_v15  ;;  %v293_v19 = vsub.f32 %v291_v12, %v292_v16 }
  0x62   : > { %589 = vmatprep.mubr.f32.mxu0 %v1086_v0  ;;  %v681_v30 = vadd.f32 %v680_v28, %v679_v26  ;;  %v688_v31 = vadd.f32 %v687_v29, %v686_v27  ;;  %p999_p8 = pneg %p998_p6  ;;  %p1005_p0 = por %p1004_p12, %p1003_p9 }
  0x63   : > { %v277_v20 = vand.u32 4294901760, %v276_v17  ;;  %v287_v21 = vsub.f32 %v285_v15, %v286_v18  ;;  %522 = vmatprep.subr.mxu0 %v286_v18  ;;  %v294_v22 = vand.u32 4294901760, %v293_v19 }
  0x64   : > { %526 = vmatpush1.msra.mxu0 %v292_v16  ;;  %v682_v32 = vrot.slane %v681_v30, 2  ;;  %v689_v33 = vrot.slane %v688_v31, 2  ;;  %p1006_p5 = pnand %p1005_p0, %p999_p8 }
  0x65   : > { %278 = vmatmul.mubr.f32.vlgmr.msra.gmra.mrb[0].mxu1 %v277_v20  ;;  %v288_v23 = vand.u32 4294901760, %v287_v21  ;;  %598 = vmatprep.subr.mxu0 %v206_v11 }
  0x66   : > { %358 = vmatprep.mubr.f32.mxu1 %v1086_v0  ;;  %v683_v34 = vadd.f32 %v682_v32, %v681_v30  ;;  %v690_v35 = vadd.f32 %v689_v33, %v688_v31 }
  0x67   : > { %289 = vmatprep.subr.mxu1 %v288_v23 }
  0x68   : > { %295 = vmatpush1.msra.mxu1 %v294_v22  ;;  %v684_v36 = vrot.slane %v683_v34, 1  ;;  %v691_v37 = vrot.slane %v690_v35, 1 }
  0x69   : > { %591 = vmatmul.mubr.f32.vlgmr.msra.gmra.mrb[0].mxu0 %v273_v8  ;;  %368 = vmatprep.subr.mxu1 %v285_v15 }
  0x6a   : > { %600 = vmatpush1.msra.mxu0 %v208_v7  ;;  %663 = vmatprep.mubr.f32.mxu0 %v1086_v0  ;;  %v685_v40 = vadd.f32 %v684_v36, %v683_v34  ;;  %v692_v42 = vadd.f32 %v691_v37, %v690_v35 }
  0x6d   : > { %360 = vmatmul.mubr.f32.vlgmr.msra.gmra.mrb[0].mxu1 %v273_v8 }
  0x6e   : > { %371 = vmatpush1.msra.mxu1 %v291_v12  ;;  %434 = vmatprep.mubr.f32.mxu1 %v1086_v0 }
  0x71   : > { %665 = vmatmul.mubr.f32.vlgmr.msra.gmra.mrb[0].mxu0 %v273_v8 }
  0x75   : > { %437 = vmatmul.mubr.f32.vlgmr.msra.gmra.mrb[0].mxu1 %v274_v13 }
  0xea   : > { %v674_v41 = vpop.xlane.xlu0 %673 }
  0xeb   : > { %v693_v46 = vadd.f32 %v685_v40, %v674_v41  ;;  %v694_v48 = vadd.f32 %v692_v42, %v674_v41 }
 0x144   : > { %v666_v38 = vpop.f32.mrb[0].mxu0 }
 0x145   : > { %v668_v39 = vpop.f32.mrb[1].mxu0 }
 0x148   : > { %v438_v43 = vpop.f32.mrb[0].mxu1 }
 0x149   : > { %v849_v44 = vadd.f32 %v666_v38, %v438_v43  ;;  %v440_v45 = vpop.f32.mrb[1].mxu1 }
 0x14a   : > { %v850_v47 = vadd.f32 %v668_v39, %v440_v45 }
 0x14b   : > { %v695_v49 = vmul.f32 2.0, %v849_v44 }
 0x14c   : > { %v696_v50 = vmul.f32 2.0, %v850_v47 }
 0x14d   : > { %v697_v51 = vsub.f32 %v693_v46, %v695_v49 }
 0x14e   : > { %v698_v52 = vsub.f32 %v694_v48, %v696_v50 }
 0x14f   : > { %v699_v53 = vmax.f32 %v697_v51, 0.0 }
 0x150   : > { %v700_v54 = vmax.f32 %v698_v52, 0.0 }
 0x151   : > { %934 = vrsqrt.f32 %v699_v53  ;;  %vm703_vm2 = vcmp.eq.f32.partialorder %v699_v53, inf  ;;  %v706_v58 = vand.u32 2147483648, %v699_v53  ;;  %vm705_vm3 = vcmp.eq.f32.partialorder %v699_v53, 0.0 }
 0x152   : > { %936 = vrsqrt.f32 %v700_v54  ;;  %vm710_vm4 = vcmp.eq.f32.partialorder %v700_v54, inf  ;;  %v713_v61 = vand.u32 2147483648, %v700_v54  ;;  %vm712_vm5 = vcmp.eq.f32.partialorder %v700_v54, 0.0 }
 0x15b   : > { %v935_v55 = vpop.eup %934 }
 0x15c   : > { %v937_v56 = vpop.eup %936  ;;  %v702_v57 = vmul.f32 %v935_v55, %v699_v53 }
 0x15d   : > { %v709_v59 = vmul.f32 %v937_v56, %v700_v54 }
 0x15e   : > { %v704_v60 = vsel %vm703_vm2, %v699_v53, %v702_v57 }
 0x15f   : > { %v707_v62 = vsel %vm705_vm3, %v706_v58, %v704_v60  ;;  %v711_v63 = vsel %vm710_vm4, %v700_v54, %v709_v59 }
 0x160   : > { %v714_v0 = vsel %vm712_vm5, %v713_v61, %v711_v63  ;;  %715 = vst [vmem:[%s190_s21] sm:$0xff] %v707_v62 }
 0x161   : > { %716 = vst [vmem:[%s190_s21 + $0x8] sm:$0xff] %v714_v0 }
 0x162   : > { %1009 = shalt.err (!%p1006_p5)
}
 0x163   : > { %s1010_s27 = scalar_lea.hbm %s1275_s8, 256  ;;  %s1014_s18 = scalar_lea.hbm %s1326_s2, 512 }
 0x164   : > { %p1011_p10 = scmp.ne.s32.totalorder %s1275_s8, %s1010_s27  ;;  %p1015_p7 = scmp.lt.u32.totalorder %s1275_s8, %s1326_s2 }
 0x165   : > { %p1016_p3 = scmp.lt.u32.totalorder %s1014_s18, %s1010_s27  ;;  %p1018_p11 = scmp.lt.u32.totalorder %s1010_s27, %s1275_s8 }
 0x166   : > { %p1012_p1 = pnand %p1011_p10, %p1204_p13 }
 0x167   : > { %p1017_p4 = por %p1016_p3, %p1015_p7 }
 0x168   : > { %p1013_p2 = pneg %p1012_p1 }
 0x169   : > { %p1019_p6 = por %p1018_p11, %p1017_p4 }
 0x16b   : > { %p1020_p8 = pnand %p1019_p6, %p1013_p2 }
 0x16d   : > { %1023 = shalt.err (!%p1020_p8)
}
 0x16e   : > { %865 = dma.vmem_to_hbm [thread:$0]  (%p1204_p13), %s1277_s3, 256, %s1275_s8, %s718_s12  }
 0x16f PF: > { %s746_s7 = sand.u32 1, %s1062_s9   ;;  %p1345_p9 = scmp.ne.s32.totalorder %s1334_s20, 0 }
 0x170   : > { %p1346_p12 = scmp.ge.s32.totalorder %s1082_s14, 2  ;;  %s747_s17 = scalar_lea.sflag [#allocation4], %s746_s7 }
 0x172   : > { %p876_p0 = pnand %p1346_p12, %p1345_p9 }
 0x174   : > { %1057 = dma.done.wait (!%p876_p0), %s747_s17, 256  }
 0x175   : > { %1059 = vsyncadd (!%p876_p0), %s747_s17, 4294967040  ;;  %s19_s14 = sadd.s32 1, %s1082_s14   ;;  %s1347_s9 = smov %s1066_s10 }
 0x176   : > { %p16_p5 = scmp.ge.s32.totalorder %s19_s14, 4   ;;  %s1348_s10 = smov %s1070_s11 }
 0x177   : > { %s1349_s11 = smov %s1212_s28  ;;  %s1350_s12 = smov %s1078_s13 }
 0x178   : > { %s1351_s13 = smov %s1353_s25  ;;  %18 = sbr.rel (!%p16_p5) target bundleno = 7 (0x7), region = 78 }
 0x17f   :  { %752 = vsyncpa [#allocation3], 1 }
 0x180   :  { %754 = vsyncpa [#allocation3 + $0x1], 1 }
 0x181   :  { %755 = vsyncpa [#allocation6], 1 }
 0x182   :  { %757 = vsyncpa [#allocation6 + $0x1], 1 }
 0x183   :  { %758 = vsyncpa [#allocation4], 1 }
 0x184   :  { %760 = vsyncpa [#allocation4 + $0x1], 1 }

</bundles_post_ra>
